<compile_context>
chip_gen: v7x
topology: tpu7x:2x2x1
jax: 0.10.0
libtpu: 0.0.40
codegen_flags: <defaults>
</compile_context>

<pallas_src>
import jax
import jax.numpy as jnp
from jax import lax
from jax.experimental import pallas as pl
from jax.experimental.pallas import tpu as pltpu

B = 2          # batch
L = 16         # sequence length
C_IN = 6       # input_channels
C1 = 16        # conv1 out channels
C2 = 32        # conv2 out channels
D_OUT = 64     # output_dim
EPS = 1e-5
N = B * L      # rows of the fused (B*L, C) channels-last tile

# Packed parameter slab layout (all block starts 8-sublane aligned, 128 lanes).
SLAB_COLS = 128
W1_ROW = 0        # W1_cat (3*C_IN, C1) = (18, 16), block rows   0:24
W2_ROW = 24       # W2_cat (3*C1,  C2)  = (48, 32), block rows  24:72
WFC_ROW = 72      # Wfc    (C2, 128), lanes 64:128 zero,  rows  72:104
VEC_ROW = 104     # 8 rows: b1, g1, be1, b2, g2, be2, bfc, 0
POOL_ROW = 112    # (B, N) average-pool matrix,            rows 112:120
MASKP_ROW = 120   # (N, 128) 0/1 mask for the "prev row" tap (l != 0)
MASKN_ROW = 152   # (N, 128) 0/1 mask for the "next row" tap (l != L-1)
SLAB_ROWS = 184


def encoder_kernel(x_ref, p_ref, out_ref):
    x = x_ref[...]                                         # (N, C_IN) f32

    # ---- per-channel parameter rows: one aligned (8, 128) load ----
    vec = p_ref[VEC_ROW:VEC_ROW + 8, :]
    b1, g1, be1 = vec[0:1, :C1], vec[1:2, :C1], vec[2:3, :C1]
    b2, g2, be2 = vec[3:4, :C2], vec[4:5, :C2], vec[5:6, :C2]
    bfc = vec[6:7, :]                                      # (1, 128), lanes 64: zero

    def conv3_relu(h, w_row, c_out, bias):
        """k=3, pad=1 conv as ONE fused matmul on [h_prev | h | h_next]."""
        c = h.shape[1]
        z = jnp.zeros((1, c), jnp.float32)
        # Zero-padded +-1 sublane shifts (the conv's padding=1).  The slab
        # masks additionally zero the rows that would cross a batch boundary.
        h_prev = (jnp.concatenate([z, h[:N - 1, :]], axis=0)
                  * p_ref[MASKP_ROW:MASKP_ROW + N, :c])
        h_next = (jnp.concatenate([h[1:, :], z], axis=0)
                  * p_ref[MASKN_ROW:MASKN_ROW + N, :c])
        hcat = jnp.concatenate([h_prev, h, h_next], axis=1)          # (N, 3c)
        w = p_ref[w_row:w_row + 3 * c, :c_out]                       # (3c, c_out)
        acc = jnp.dot(hcat, w, preferred_element_type=jnp.float32) + bias
        return jnp.maximum(acc, 0.0)

    def batchnorm(h, gamma, beta):
        """Train-mode batch stats; both moments from one cross-sublane reduce."""
        c = h.shape[1]
        stats = jnp.mean(jnp.concatenate([h, h * h], axis=1),
                         axis=0, keepdims=True)                      # (1, 2c)
        m = stats[:, :c]
        var = stats[:, c:] - m * m
        scale = gamma * lax.rsqrt(var + EPS)
        return h * scale + (beta - m * scale)

    # ---- Conv1(6 -> 16) + ReLU + BN, Conv2(16 -> 32) + ReLU + BN ----
    h1 = batchnorm(conv3_relu(x, W1_ROW, C1, b1), g1, be1)           # (N, 16)
    h2 = batchnorm(conv3_relu(h1, W2_ROW, C2, b2), g2, be2)          # (N, 32)

    # ---- AdaptiveAvgPool1d(1): per-sequence mean over L via slab matrix ----
    pool = p_ref[POOL_ROW:POOL_ROW + B, :N]                          # (B, N)
    pooled = jnp.dot(pool, h2, preferred_element_type=jnp.float32)   # (B, 32)

    # ---- Linear(32 -> 64), padded to 128 lanes for a dense store ----
    wfc = p_ref[WFC_ROW:WFC_ROW + C2, :]                             # (32, 128)
    out_ref[...] = jnp.dot(pooled, wfc,
                           preferred_element_type=jnp.float32) + bfc


@jax.jit
def tiny_cnn_plus_encoder(x, param_slab):
    # (B, L, C_in) -> (B*L, C_in): free, host-side layout plumbing.
    x2d = x.reshape(N, C_IN)
    out_pad = pl.pallas_call(
        encoder_kernel,
        out_shape=jax.ShapeDtypeStruct((B, 128), jnp.float32),
        in_specs=[pl.BlockSpec(memory_space=pltpu.MemorySpace.VMEM),
                  pl.BlockSpec(memory_space=pltpu.MemorySpace.VMEM)],
        out_specs=pl.BlockSpec(memory_space=pltpu.MemorySpace.VMEM),
    )(x2d, param_slab)
    return out_pad[:, :D_OUT]


def make_params(key):
    ks = jax.random.split(key, 10)
    return {
        # conv weights stored as (K, Cin, Cout) == torch weight (Cout,Cin,K) transposed
        "w1": jax.random.normal(ks[0], (3, C_IN, C1), jnp.float32) * 0.2,
        "b1": jax.random.normal(ks[1], (1, C1), jnp.float32) * 0.1,
        "g1": 1.0 + 0.1 * jax.random.normal(ks[2], (1, C1), jnp.float32),
        "be1": 0.1 * jax.random.normal(ks[3], (1, C1), jnp.float32),
        "w2": jax.random.normal(ks[4], (3, C1, C2), jnp.float32) * 0.2,
        "b2": jax.random.normal(ks[5], (1, C2), jnp.float32) * 0.1,
        "g2": 1.0 + 0.1 * jax.random.normal(ks[6], (1, C2), jnp.float32),
        "be2": 0.1 * jax.random.normal(ks[7], (1, C2), jnp.float32),
        "wfc": jax.random.normal(ks[8], (C2, D_OUT), jnp.float32) * 0.2,
        "bfc": jax.random.normal(ks[9], (1, D_OUT), jnp.float32) * 0.1,
    }


def pack_params(p):
    """Pack all parameters + constants into one (184, 128) f32 slab."""
    def pad_block(a, rows):
        return jnp.pad(a, ((0, rows - a.shape[0]), (0, SLAB_COLS - a.shape[1])))

    # conv taps stacked along the contraction dim (fused per-conv matmul)
    w1cat = jnp.concatenate([p["w1"][k] for k in range(3)], axis=0)   # (18, 16)
    w2cat = jnp.concatenate([p["w2"][k] for k in range(3)], axis=0)   # (48, 32)

    vec = jnp.zeros((8, SLAB_COLS), jnp.float32)
    vec = vec.at[0, :C1].set(p["b1"][0]).at[1, :C1].set(p["g1"][0])
    vec = vec.at[2, :C1].set(p["be1"][0]).at[3, :C2].set(p["b2"][0])
    vec = vec.at[4, :C2].set(p["g2"][0]).at[5, :C2].set(p["be2"][0])
    vec = vec.at[6, :D_OUT].set(p["bfc"][0])

    rows = jnp.arange(N)
    pool = jnp.where((rows[None, :] // L) == jnp.arange(B)[:, None],
                     1.0 / L, 0.0).astype(jnp.float32)                # (B, N)

    l_idx = rows % L
    mask_p = jnp.broadcast_to((l_idx != 0).astype(jnp.float32)[:, None],
                              (N, SLAB_COLS))
    mask_n = jnp.broadcast_to((l_idx != (L - 1)).astype(jnp.float32)[:, None],
                              (N, SLAB_COLS))

    slab = jnp.concatenate([
        pad_block(w1cat, 24),          # rows   0:24
        pad_block(w2cat, 48),          # rows  24:72
        pad_block(p["wfc"], 32),       # rows  72:104 (output lanes 64:128 zero)
        vec,                           # rows 104:112
        pad_block(pool, 8),            # rows 112:120
        mask_p,                        # rows 120:152
        mask_n,                        # rows 152:184
    ], axis=0)
    assert slab.shape == (SLAB_ROWS, SLAB_COLS)
    return slab


def reference_forward(x, p):
    """Pure-JAX reference mirroring the PyTorch forward (train-mode BN)."""
    def conv(xb, w, b):
        xp = jnp.pad(xb, ((1, 1), (0, 0)))
        return sum(xp[k:k + L, :] @ w[k] for k in range(3)) + b

    h1 = jnp.stack([jnp.maximum(conv(x[b], p["w1"], p["b1"][0]), 0.0)
                    for b in range(B)], 0)                  # (B, L, C1)
    m1 = h1.reshape(-1, C1).mean(0)
    v1 = ((h1.reshape(-1, C1) - m1) ** 2).mean(0)
    h1 = (h1 - m1) / jnp.sqrt(v1 + EPS) * p["g1"][0] + p["be1"][0]

    h2 = jnp.stack([jnp.maximum(conv(h1[b], p["w2"], p["b2"][0]), 0.0)
                    for b in range(B)], 0)                  # (B, L, C2)
    m2 = h2.reshape(-1, C2).mean(0)
    v2 = ((h2.reshape(-1, C2) - m2) ** 2).mean(0)
    h2 = (h2 - m2) / jnp.sqrt(v2 + EPS) * p["g2"][0] + p["be2"][0]

    pooled = h2.mean(axis=1)                                # (B, C2)
    return pooled @ p["wfc"] + p["bfc"][0]


if __name__ == "__main__":
    key = jax.random.PRNGKey(0)
    kx, kp = jax.random.split(key)
    # module input: (batch, seq_len, input_channels) — it permutes internally
    x = jax.random.normal(kx, (B, L, C_IN), jnp.float32)
    params = make_params(kp)
    slab = pack_params(params)          # packed once, host-side

    out = jax.block_until_ready(tiny_cnn_plus_encoder(x, slab))
    ref = reference_forward(x, params)

    assert out.shape == (B, D_OUT)
    err = jnp.max(jnp.abs(out - ref))
    assert jnp.allclose(out, ref, atol=1e-4, rtol=1e-4), f"max abs err {err}"
    print("KERNEL_OK")
</pallas_src>

<mosaic_0001>
module attributes {stable_mosaic.version = 11 : i64} {
  func.func @encoder_kernel(%arg0: memref<32x6xf32, #tpu.memory_space<vmem>>, %arg1: memref<184x128xf32, #tpu.memory_space<vmem>>, %arg2: memref<2x128xf32, #tpu.memory_space<vmem>>) attributes {dimension_semantics = [], scalar_prefetch = 0 : i64, scratch_operands = 0 : i64, tpu.core_type = #tpu.core_type<tc>} {
    %c0 = arith.constant 0 : index
    %c0_0 = arith.constant 0 : index
    %0 = vector.load %arg0[%c0, %c0_0] : memref<32x6xf32, #tpu.memory_space<vmem>>, vector<32x6xf32>
    %c104 = arith.constant 104 : index
    %c0_1 = arith.constant 0 : index
    %1 = vector.load %arg1[%c104, %c0_1] : memref<184x128xf32, #tpu.memory_space<vmem>>, vector<8x128xf32>
    %2 = vector.extract_strided_slice %1 {offsets = [0, 0], sizes = [1, 16], strides = [1, 1]} : vector<8x128xf32> to vector<1x16xf32>
    %3 = vector.extract_strided_slice %1 {offsets = [1, 0], sizes = [1, 16], strides = [1, 1]} : vector<8x128xf32> to vector<1x16xf32>
    %4 = vector.extract_strided_slice %1 {offsets = [2, 0], sizes = [1, 16], strides = [1, 1]} : vector<8x128xf32> to vector<1x16xf32>
    %5 = vector.extract_strided_slice %1 {offsets = [3, 0], sizes = [1, 32], strides = [1, 1]} : vector<8x128xf32> to vector<1x32xf32>
    %6 = vector.extract_strided_slice %1 {offsets = [4, 0], sizes = [1, 32], strides = [1, 1]} : vector<8x128xf32> to vector<1x32xf32>
    %7 = vector.extract_strided_slice %1 {offsets = [5, 0], sizes = [1, 32], strides = [1, 1]} : vector<8x128xf32> to vector<1x32xf32>
    %8 = vector.extract_strided_slice %1 {offsets = [6, 0], sizes = [1, 128], strides = [1, 1]} : vector<8x128xf32> to vector<1x128xf32>
    %cst = arith.constant 0.000000e+00 : f32
    %9 = vector.broadcast %cst : f32 to vector<1x6xf32>
    %10 = vector.extract_strided_slice %0 {offsets = [0, 0], sizes = [31, 6], strides = [1, 1]} : vector<32x6xf32> to vector<31x6xf32>
    %11 = tpu.concatenate %9, %10 in 0 : vector<1x6xf32>, vector<31x6xf32> -> vector<32x6xf32>
    %c120 = arith.constant 120 : index
    %c0_2 = arith.constant 0 : index
    %12 = vector.load %arg1[%c120, %c0_2] : memref<184x128xf32, #tpu.memory_space<vmem>>, vector<32x6xf32>
    %13 = arith.mulf %11, %12 : vector<32x6xf32>
    %14 = vector.extract_strided_slice %0 {offsets = [1, 0], sizes = [31, 6], strides = [1, 1]} : vector<32x6xf32> to vector<31x6xf32>
    %15 = tpu.concatenate %14, %9 in 0 : vector<31x6xf32>, vector<1x6xf32> -> vector<32x6xf32>
    %c152 = arith.constant 152 : index
    %c0_3 = arith.constant 0 : index
    %16 = vector.load %arg1[%c152, %c0_3] : memref<184x128xf32, #tpu.memory_space<vmem>>, vector<32x6xf32>
    %17 = arith.mulf %15, %16 : vector<32x6xf32>
    %18 = tpu.concatenate %13, %0, %17 in 1 : vector<32x6xf32>, vector<32x6xf32>, vector<32x6xf32> -> vector<32x18xf32>
    %c0_4 = arith.constant 0 : index
    %c0_5 = arith.constant 0 : index
    %19 = vector.load %arg1[%c0_4, %c0_5] : memref<184x128xf32, #tpu.memory_space<vmem>>, vector<18x16xf32>
    %cst_6 = arith.constant dense<0.000000e+00> : vector<32x16xf32>
    %20 = tpu.matmul %18, %19, %cst_6 {dimension_numbers = #tpu.dot_dimension_numbers<[1], [0], [0], [1], [0, 0, 1, 1], [], []>} : vector<32x18xf32>, vector<18x16xf32>, vector<32x16xf32> -> vector<32x16xf32>
    %21 = vector.broadcast %2 : vector<1x16xf32> to vector<32x16xf32>
    %22 = arith.addf %20, %21 : vector<32x16xf32>
    %cst_7 = arith.constant 0.000000e+00 : f32
    %23 = vector.broadcast %cst_7 : f32 to vector<32x16xf32>
    %24 = arith.maximumf %22, %23 : vector<32x16xf32>
    %25 = arith.mulf %24, %24 : vector<32x16xf32>
    %26 = tpu.concatenate %24, %25 in 1 : vector<32x16xf32>, vector<32x16xf32> -> vector<32x32xf32>
    %cst_8 = arith.constant dense<0.000000e+00> : vector<32xf32>
    %27 = vector.multi_reduction <add>, %26, %cst_8 [0] : vector<32x32xf32> to vector<32xf32>
    %28 = vector.shape_cast %27 : vector<32xf32> to vector<1x32xf32>
    %cst_9 = arith.constant 3.200000e+01 : f32
    %29 = vector.broadcast %cst_9 : f32 to vector<1x32xf32>
    %30 = arith.divf %28, %29 : vector<1x32xf32>
    %31 = vector.extract_strided_slice %30 {offsets = [0, 0], sizes = [1, 16], strides = [1, 1]} : vector<1x32xf32> to vector<1x16xf32>
    %32 = vector.extract_strided_slice %30 {offsets = [0, 16], sizes = [1, 16], strides = [1, 1]} : vector<1x32xf32> to vector<1x16xf32>
    %33 = arith.mulf %31, %31 : vector<1x16xf32>
    %34 = arith.subf %32, %33 : vector<1x16xf32>
    %cst_10 = arith.constant 9.99999974E-6 : f32
    %35 = vector.broadcast %cst_10 : f32 to vector<1x16xf32>
    %36 = arith.addf %34, %35 : vector<1x16xf32>
    %37 = math.rsqrt %36 : vector<1x16xf32>
    %38 = arith.mulf %3, %37 : vector<1x16xf32>
    %39 = vector.broadcast %38 : vector<1x16xf32> to vector<32x16xf32>
    %40 = arith.mulf %24, %39 : vector<32x16xf32>
    %41 = arith.mulf %31, %38 : vector<1x16xf32>
    %42 = arith.subf %4, %41 : vector<1x16xf32>
    %43 = vector.broadcast %42 : vector<1x16xf32> to vector<32x16xf32>
    %44 = arith.addf %40, %43 : vector<32x16xf32>
    %cst_11 = arith.constant 0.000000e+00 : f32
    %45 = vector.broadcast %cst_11 : f32 to vector<1x16xf32>
    %46 = vector.extract_strided_slice %44 {offsets = [0, 0], sizes = [31, 16], strides = [1, 1]} : vector<32x16xf32> to vector<31x16xf32>
    %47 = tpu.concatenate %45, %46 in 0 : vector<1x16xf32>, vector<31x16xf32> -> vector<32x16xf32>
    %c120_12 = arith.constant 120 : index
    %c0_13 = arith.constant 0 : index
    %48 = vector.load %arg1[%c120_12, %c0_13] : memref<184x128xf32, #tpu.memory_space<vmem>>, vector<32x16xf32>
    %49 = arith.mulf %47, %48 : vector<32x16xf32>
    %50 = vector.extract_strided_slice %44 {offsets = [1, 0], sizes = [31, 16], strides = [1, 1]} : vector<32x16xf32> to vector<31x16xf32>
    %51 = tpu.concatenate %50, %45 in 0 : vector<31x16xf32>, vector<1x16xf32> -> vector<32x16xf32>
    %c152_14 = arith.constant 152 : index
    %c0_15 = arith.constant 0 : index
    %52 = vector.load %arg1[%c152_14, %c0_15] : memref<184x128xf32, #tpu.memory_space<vmem>>, vector<32x16xf32>
    %53 = arith.mulf %51, %52 : vector<32x16xf32>
    %54 = tpu.concatenate %49, %44, %53 in 1 : vector<32x16xf32>, vector<32x16xf32>, vector<32x16xf32> -> vector<32x48xf32>
    %c24 = arith.constant 24 : index
    %c0_16 = arith.constant 0 : index
    %55 = vector.load %arg1[%c24, %c0_16] : memref<184x128xf32, #tpu.memory_space<vmem>>, vector<48x32xf32>
    %cst_17 = arith.constant dense<0.000000e+00> : vector<32x32xf32>
    %56 = tpu.matmul %54, %55, %cst_17 {dimension_numbers = #tpu.dot_dimension_numbers<[1], [0], [0], [1], [0, 0, 1, 1], [], []>} : vector<32x48xf32>, vector<48x32xf32>, vector<32x32xf32> -> vector<32x32xf32>
    %57 = vector.broadcast %5 : vector<1x32xf32> to vector<32x32xf32>
    %58 = arith.addf %56, %57 : vector<32x32xf32>
    %cst_18 = arith.constant 0.000000e+00 : f32
    %59 = vector.broadcast %cst_18 : f32 to vector<32x32xf32>
    %60 = arith.maximumf %58, %59 : vector<32x32xf32>
    %61 = arith.mulf %60, %60 : vector<32x32xf32>
    %62 = tpu.concatenate %60, %61 in 1 : vector<32x32xf32>, vector<32x32xf32> -> vector<32x64xf32>
    %cst_19 = arith.constant dense<0.000000e+00> : vector<64xf32>
    %63 = vector.multi_reduction <add>, %62, %cst_19 [0] : vector<32x64xf32> to vector<64xf32>
    %64 = vector.shape_cast %63 : vector<64xf32> to vector<1x64xf32>
    %cst_20 = arith.constant 3.200000e+01 : f32
    %65 = vector.broadcast %cst_20 : f32 to vector<1x64xf32>
    %66 = arith.divf %64, %65 : vector<1x64xf32>
    %67 = vector.extract_strided_slice %66 {offsets = [0, 0], sizes = [1, 32], strides = [1, 1]} : vector<1x64xf32> to vector<1x32xf32>
    %68 = vector.extract_strided_slice %66 {offsets = [0, 32], sizes = [1, 32], strides = [1, 1]} : vector<1x64xf32> to vector<1x32xf32>
    %69 = arith.mulf %67, %67 : vector<1x32xf32>
    %70 = arith.subf %68, %69 : vector<1x32xf32>
    %cst_21 = arith.constant 9.99999974E-6 : f32
    %71 = vector.broadcast %cst_21 : f32 to vector<1x32xf32>
    %72 = arith.addf %70, %71 : vector<1x32xf32>
    %73 = math.rsqrt %72 : vector<1x32xf32>
    %74 = arith.mulf %6, %73 : vector<1x32xf32>
    %75 = vector.broadcast %74 : vector<1x32xf32> to vector<32x32xf32>
    %76 = arith.mulf %60, %75 : vector<32x32xf32>
    %77 = arith.mulf %67, %74 : vector<1x32xf32>
    %78 = arith.subf %7, %77 : vector<1x32xf32>
    %79 = vector.broadcast %78 : vector<1x32xf32> to vector<32x32xf32>
    %80 = arith.addf %76, %79 : vector<32x32xf32>
    %c112 = arith.constant 112 : index
    %c0_22 = arith.constant 0 : index
    %81 = vector.load %arg1[%c112, %c0_22] : memref<184x128xf32, #tpu.memory_space<vmem>>, vector<2x32xf32>
    %cst_23 = arith.constant dense<0.000000e+00> : vector<2x32xf32>
    %82 = tpu.matmul %81, %80, %cst_23 {dimension_numbers = #tpu.dot_dimension_numbers<[1], [0], [0], [1], [0, 0, 1, 1], [], []>} : vector<2x32xf32>, vector<32x32xf32>, vector<2x32xf32> -> vector<2x32xf32>
    %c72 = arith.constant 72 : index
    %c0_24 = arith.constant 0 : index
    %83 = vector.load %arg1[%c72, %c0_24] : memref<184x128xf32, #tpu.memory_space<vmem>>, vector<32x128xf32>
    %cst_25 = arith.constant dense<0.000000e+00> : vector<2x128xf32>
    %84 = tpu.matmul %82, %83, %cst_25 {dimension_numbers = #tpu.dot_dimension_numbers<[1], [0], [0], [1], [0, 0, 1, 1], [], []>} : vector<2x32xf32>, vector<32x128xf32>, vector<2x128xf32> -> vector<2x128xf32>
    %85 = vector.broadcast %8 : vector<1x128xf32> to vector<2x128xf32>
    %86 = arith.addf %84, %85 : vector<2x128xf32>
    %c0_26 = arith.constant 0 : index
    %c0_27 = arith.constant 0 : index
    %87 = vector.load %arg2[%c0_26, %c0_27] : memref<2x128xf32, #tpu.memory_space<vmem>>, vector<2x128xf32>
    tpu.vector_store %arg2[%c0_26, %c0_27], %86 {strides = array<i32>} : memref<2x128xf32, #tpu.memory_space<vmem>>, vector<2x128xf32>,
    return
  }
}

</mosaic_0001>

<bundles_post_ra>
// kernel: tiny_cnn_plus_encoder.1
= control target key start
LH: loop header
LB: loop body
LE: loop exit
PB: predicated region body
PF: predicated region fallthrough
CT: control target
= control target key end

     0   :  { %7 = vsyncpa [#allocation3], 0  ;;  %s1154_s0 = inlined_call_operand.vmem [shape: f32[32,6], index: 0, kind: input, shape index: {}]   ;;  %s1155_s1 = inlined_call_operand.hbm [shape: f32[184,128], index: 1, kind: input, shape index: {}]   ;;  %s1156_s2 = inlined_call_operand.hbm [shape: f32[2,128], index: 2, kind: output, shape index: {}]  }
   0x1   :  { %8 = vsyncpa [#allocation4], 0  ;;  %s916_s9 = smov [#allocation2]   ;;  %s868_s13 = scalar_lea.hbm %s1155_s1, 2944 }
   0x2   :  { %s16_s10 = sshll.u32 %s916_s9, 4  ;;  %p869_p0 = scmp.ne.s32.totalorder %s1155_s1, %s868_s13  ;;  %s17_s10 = int_to_ptr.vmem [resolvable:$true] %s16_s10 }
   0x3   :  { %p872_p1 = scmp.lt.u32.totalorder %s868_s13, %s1155_s1 }
   0x5   :  { %p874_p2 = pnand %p872_p1, %p869_p0 }
   0x7   :  { %877 = shalt.err (!%p874_p2)
}
   0x8   :  { %s878_s18 = scalar_lea.vmem %s17_s10, 2944  ;;  %p883_p4 = scmp.lt.s32.totalorder %s17_s10, %s17_s10 }
   0x9   :  { %p879_p3 = scmp.ne.s32.totalorder %s17_s10, %s878_s18  ;;  %p884_p5 = scmp.lt.s32.totalorder %s878_s18, %s878_s18 }
   0xb   :  { %p885_p6 = por %p884_p5, %p883_p4 }
   0xd   :  { %p886_p7 = pnand %p885_p6, %p879_p3 }
   0xf   :  { %889 = shalt.err (!%p886_p7)
}
  0x10   :  { %s917_s19 = smov 128   ;;  %s918_s20 = smov 8  }
  0x11   :  { %22 = dma.hbm_to_vmem [thread:$0]  %s1155_s1, 2944, %s17_s10, [#allocation3], %s917_s19, %s917_s19, %s918_s20  }
  0x12   :  { %912 = dma.done.wait [#allocation3], 2944  }
  0x13   :  { %913 = vsyncadd [#allocation3], 4294964352  ;;  %v26_v0 = vld [vmem:[%s1154_s0] sm:$0xff]  ;;  %v29_v1 = vld [vmem:[%s1154_s0 + $0x18] sm:$0xff]  ;;  %s919_s29 = smov 6   ;;  %vm56_vm0 = vcmask 1046528   ;;  %v118_v56 = vlaneseq }
  0x14   :  { %v27_v2 = vld [vmem:[%s1154_s0 + $0x8] sm:$0xff]  ;;  %77 = vrot.lane.b32.xlu0 %v26_v0, %s919_s29  ;;  %v57_v3 = vrot.slane %v26_v0, 1  ;;  %83 = vrot.lane.b32.xlu1 %v29_v1, %s919_s29  ;;  %v41_v4 = vrot.slane %v29_v1, 7  ;;  %v62_v5 = vrot.slane %v29_v1, 1  ;;  %v28_v6 = vld [vmem:[%s1154_s0 + $0x10] sm:$0xff]  ;;  %v970_v9 = vld [vmem:[#allocation2 + $0x98] sm:$0xff] }
  0x15   :  { %v37_v7 = vrot.slane %v27_v2, 7  ;;  %v58_v8 = vrot.slane %v27_v2, 1  ;;  %v39_v10 = vrot.slane %v28_v6, 7  ;;  %v60_v11 = vrot.slane %v28_v6, 1  ;;  %v974_v15 = vld [vmem:[#allocation2 + $0xa0] sm:$0xff]  ;;  %v116_v17 = vld [vmem:[#allocation2 + $0x8] sm:$0xff] }
  0x16   :  { %vm35_vm1 = vcmask 1040384   ;;  %v36_v12 = vrot.slane %v26_v0, 7  ;;  %v115_v16 = vld [vmem:[#allocation2] sm:$0xff]  ;;  %v979_v20 = vld [vmem:[#allocation2 + $0xa8] sm:$0xff]  ;;  %s920_s0 = smov 12   ;;  %vm135_vm2 = vcmask 1041408  }
  0x17   :  { %v59_v13 = vsel %vm56_vm0, %v57_v3, %v58_v8  ;;  %v61_v14 = vsel %vm56_vm0, %v58_v8, %v60_v11  ;;  %v63_v19 = vsel %vm56_vm0, %v60_v11, %v62_v5  ;;  %v42_v21 = vsel %vm35_vm1, %v39_v10, %v41_v4  ;;  %v117_v26 = vld [vmem:[#allocation2 + $0x10] sm:$0x3]  ;;  %v992_v32 = vld [vmem:[#allocation2 + $0x78] sm:$0xff]  ;;  %v995_v36 = vld [vmem:[#allocation2 + $0x80] sm:$0xff]  ;;  %s921_s3 = smov 16   ;;  %s922_s4 = smov 112  }
  0x18   :  { %79 = vrot.lane.b32.xlu0 %v27_v2, %s919_s29  ;;  %v73_v18 = vmul.f32 %v970_v9, %v59_v13  ;;  %v38_v22 = vsel %vm35_vm1, %v36_v12, %v37_v7  ;;  %v823_v23 = vpack.c.bf16 %v116_v17, %v115_v16  ;;  %v40_v24 = vsel %vm35_vm1, %v37_v7, %v39_v10  ;;  %v986_v28 = vld [vmem:[#allocation2 + $0xb0] sm:$0xff]  ;;  %v997_v38 = vld [vmem:[#allocation2 + $0x88] sm:$0xff]  ;;  %s923_s5 = smov 32   ;;  %s925_s6 = smov 96  }
  0x19   :  { %v74_v25 = vmul.f32 %v974_v15, %v61_v14  ;;  %v68_v27 = vsel %vm56_vm0, %v62_v5, 0.0  ;;  %v75_v29 = vmul.f32 %v979_v20, %v63_v19  ;;  %v47_v31 = vsel %vm35_vm1, 0.0, %v36_v12  ;;  %v1001_v42 = vld [vmem:[#allocation2 + $0x90] sm:$0xff]  ;;  %v1019_v59 = vld [vmem:[#allocation2 + $0x68] sm:$0xff]  ;;  %s928_s7 = smov [#allocation5]  }
  0x1a   :  { %93 = vrot.lane.b32.xlu1 %v73_v18, %s920_s0  ;;  %824 = vmatprep.subr.bf16.mxu0 %v823_v23  ;;  %v76_v30 = vmul.f32 %v986_v28, %v68_v27  ;;  %v52_v35 = vmul.f32 %v992_v32, %v47_v31  ;;  %vm105_vm3 = vcmask 48128   ;;  %vm110_vm4 = vcmask 97280   ;;  %s724_s8 = sshll.u32 %s928_s7, 4  ;;  %s725_s8 = int_to_ptr.vmem [resolvable:$true] %s724_s8 }
  0x1b   :  { %826 = vmatpush3.bf16.msra.mxu0 %v823_v23  ;;  %vm122_vm5 = vcmask 146432   ;;  %v53_v40 = vmul.f32 %v995_v36, %v38_v22  ;;  %v54_v44 = vmul.f32 %v997_v38, %v40_v24  ;;  %v55_v46 = vmul.f32 %v1001_v42, %v42_v21  ;;  %s890_s9 = scalar_lea.vmem %s725_s8, 32  ;;  %p895_p9 = scmp.lt.s32.totalorder %s725_s8, %s725_s8 }
  0x1c   :  { %81 = vrot.lane.b32.xlu0 %v28_v6, %s919_s29  ;;  %775 = vmatprep.subr.msk.mxu0 %vm135_vm2, %v117_v26  ;;  %v1016_v57 = vshrl.u32 %v118_v56, 7  ;;  %vm248_vm6 = vcmask 130048   ;;  %vm253_vm7 = vcmask 261120   ;;  %vm386_vm8 = vcmask 392192   ;;  %p891_p8 = scmp.ne.s32.totalorder %s725_s8, %s890_s9  ;;  %p896_p10 = scmp.lt.s32.totalorder %s890_s9, %s890_s9 }
  0x1d   :  { %vm512_vm9 = vcmask 523264   ;;  %vm926_vm10 = vmmov 0  }
  0x1e   :  { %95 = vrot.lane.b32.xlu1 %v74_v25, %s920_s0  ;;  %v120_v58 = vsub.s32 0, %v1016_v57  ;;  %p897_p11 = por %p896_p10, %p895_p9 }
  0x1f   :  { %776 = vmatpush3.msk.msra.mxu0 %vm135_vm2, %v117_v26 }
  0x20   :  { %97 = vrot.lane.b32.xlu0 %v75_v29, %s920_s0  ;;  %v121_v60 = vrot.slane %v1019_v59, %v120_v58  ;;  %p898_p12 = pnand %p897_p11, %p891_p8 }
  0x22   :  { %99 = vrot.lane.b32.xlu1 %v76_v30, %s920_s0 }
  0x86   :  { %v78_v33 = vpop.permute.xlu0 %77  ;;  %v84_v34 = vpop.permute.xlu1 %83 }
  0x87   :  { %v106_v39 = vsel %vm105_vm3, %v52_v35, %v78_v33  ;;  %v109_v53 = vsel %vm105_vm3, %v55_v46, %v84_v34 }
  0x8a   :  { %v80_v37 = vpop.permute.xlu0 %79 }
  0x8b   :  { %v107_v47 = vsel %vm105_vm3, %v53_v40, %v80_v37 }
  0x8c   :  { %v94_v41 = vpop.permute.xlu1 %93 }
  0x8d   :  { %v111_v43 = vsel %vm110_vm4, %v106_v39, %v94_v41 }
  0x8e   :  { %777 = vmatprep.mubr.msk.f32.mxu0 %vm122_vm5, %v111_v43  ;;  %v82_v45 = vpop.permute.xlu0 %81 }
  0x8f   :  { %v108_v50 = vsel %vm105_vm3, %v54_v44, %v82_v45 }
  0x90   :  { %v96_v48 = vpop.permute.xlu1 %95 }
  0x91   :  { %v112_v49 = vsel %vm110_vm4, %v107_v47, %v96_v48 }
  0x92   :  { %778 = vmatmul.mubr.msk.f32.vlgmr.msra.gmra.mrb[0].mxu0 %vm122_vm5, %v112_v49  ;;  %v98_v51 = vpop.permute.xlu0 %97  ;;  %v376_v49 = vld [vmem:[#allocation2 + $0x18] sm:$0xff] }
  0x93   :  { %v113_v52 = vsel %vm110_vm4, %v108_v50, %v98_v51  ;;  %v377_v50 = vld [vmem:[#allocation2 + $0x20] sm:$0xff] }
  0x94   :  { %v100_v54 = vpop.permute.xlu1 %99  ;;  %780 = vmatprep.mubr.msk.f32.mxu0 %vm122_vm5, %v113_v52  ;;  %v827_v51 = vpack.c.bf16 %v377_v50, %v376_v49  ;;  %v285_v52 = vsub.s32 1, %v1016_v57 }
  0x95   :  { %v114_v55 = vsel %vm110_vm4, %v109_v53, %v100_v54  ;;  %v378_v54 = vld [vmem:[#allocation2 + $0x28] sm:$0xff] }
  0x96   :  { %781 = vmatmul.mubr.msk.f32.gmra.mrb[2].mxu0 %vm122_vm5, %v114_v55  ;;  %828 = vmatprep.subr.bf16.mxu1 %v827_v51  ;;  %v379_v55 = vld [vmem:[#allocation2 + $0x30] sm:$0xff] }
  0x97   :  { %830 = vmatpush3.bf16.msra.mxu1 %v827_v51  ;;  %v831_v58 = vpack.c.bf16 %v379_v55, %v378_v54 }
  0x99   :  { %832 = vmatprep.subr.bf16.mxu1 %v831_v58 }
  0x9b   :  { %834 = vmatpush3.bf16.msra.mxu1 %v831_v58 }
 0x165   :  { %v779_v61 = vpop.f32.mrb[0].mxu0 }
 0x166   :  { %v211_v62 = vadd.f32 %v779_v61, %v121_v60  ;;  %v205_v63 = vpop.f32.mrb[1].mxu0 }
 0x167   :  { %v206_v0 = vadd.f32 %v205_v63, %v121_v60  ;;  %v381_v63 = vld [vmem:[#allocation2 + $0x40] sm:$0xff] }
 0x168   :  { %v1022_v1 = vmax.f32 %v211_v62, 0.0  ;;  %v380_v62 = vld [vmem:[#allocation2 + $0x38] sm:$0xff] }
 0x169   :  { %v1024_v2 = vmax.f32 %v206_v0, 0.0  ;;  %v782_v3 = vpop.f32.mrb[2].mxu0  ;;  %v298_v0 = vsub.s32 2, %v1016_v57 }
 0x16a   :  { %v221_v4 = vadd.f32 %v782_v3, %v121_v60  ;;  %v215_v5 = vpop.f32.mrb[3].mxu0  ;;  %v229_v6 = vmul.f32 %v1022_v1, %v1022_v1 }
 0x16b   :  { %v216_v7 = vadd.f32 %v215_v5, %v121_v60  ;;  %v228_v8 = vmul.f32 %v1024_v2, %v1024_v2 }
 0x16c   :  { %v1030_v10 = vmax.f32 %v221_v4, 0.0  ;;  %238 = vrot.lane.b32.xlu1 %v229_v6, %s921_s3  ;;  %v835_v4 = vpack.c.bf16 %v381_v63, %v380_v62 }
 0x16d   :  { %v1033_v11 = vmax.f32 %v216_v7, 0.0  ;;  %236 = vrot.lane.b32.xlu0 %v228_v8, %s921_s3 }
 0x16e   :  { %v231_v12 = vmul.f32 %v1030_v10, %v1030_v10  ;;  %836 = vmatprep.subr.bf16.mxu1 %v835_v4 }
 0x16f   :  { %v230_v13 = vmul.f32 %v1033_v11, %v1033_v11  ;;  %838 = vmatpush3.bf16.msra.mxu1 %v835_v4 }
 0x170   :  { %242 = vrot.lane.b32.xlu1 %v231_v12, %s921_s3 }
 0x171   :  { %240 = vrot.lane.b32.xlu0 %v230_v13, %s921_s3 }
 0x1de   :  { %v239_v14 = vpop.permute.xlu1 %238 }
 0x1df   :  { %v250_v16 = vsel %vm248_vm6, %v1022_v1, %v239_v14  ;;  %v237_v17 = vpop.permute.xlu0 %236 }
 0x1e0   :  { %v249_v18 = vsel %vm248_vm6, %v1024_v2, %v237_v17  ;;  %v255_v19 = vsel %vm253_vm7, %v250_v16, 0.0 }
 0x1e1   :  { %v254_v21 = vsel %vm253_vm7, %v249_v18, 0.0 }
 0x1e2   :  { %v243_v22 = vpop.permute.xlu1 %242  ;;  %v256_v24 = vadd.f32 %v255_v19, %v254_v21 }
 0x1e3   :  { %v241_v23 = vpop.permute.xlu0 %240  ;;  %v252_v25 = vsel %vm248_vm6, %v1030_v10, %v243_v22 }
 0x1e4   :  { %v251_v26 = vsel %vm248_vm6, %v1033_v11, %v241_v23  ;;  %v259_v30 = vsel %vm253_vm7, %v252_v25, 0.0 }
 0x1e5   :  { %v257_v27 = vsel %vm253_vm7, %v251_v26, 0.0 }
 0x1e6   :  { %v258_v29 = vadd.f32 %v257_v27, %v256_v24 }
 0x1e8   :  { %v260_v31 = vadd.f32 %v259_v30, %v258_v29 }
 0x1ea   :  { %v261_v33 = vrot.slane %v260_v31, 4 }
 0x1ec   :  { %v262_v34 = vadd.f32 %v261_v33, %v260_v31 }
 0x1ee   :  { %v263_v35 = vrot.slane %v262_v34, 2 }
 0x1f0   :  { %v264_v37 = vadd.f32 %v263_v35, %v262_v34 }
 0x1f2   :  { %v265_v39 = vrot.slane %v264_v37, 1 }
 0x1f4   :  { %v266_v40 = vadd.f32 %v265_v39, %v264_v37 }
 0x1f6   :  { %v268_v41 = vmul.f32 0.03125, %v266_v40 }
 0x1f8   :  { %v269_v43 = vmul.f32 %v268_v41, %v268_v41 }
 0x1fa   :  { %271 = vrot.lane.b32.xlu0 %v269_v43, %s921_s3 }
 0x26c   :  { %v272_v44 = vpop.permute.xlu0 %271 }
 0x26d   :  { %v274_v45 = vsub.f32 %v268_v41, %v272_v44 }
 0x26f   :  { %v275_v46 = vadd.f32 1e-05, %v274_v45 }
 0x271   :  { %864 = vrsqrt.f32 %v275_v46 }
 0x27b   :  { %v865_v47 = vpop.eup %864 }
 0x27c   :  { %v278_v48 = vrot.slane %v865_v47, 7 }
 0x27e   :  { %279 = vrot.lane.b32.xlu1 %v278_v48, %s922_s4 }
 0x2f0   :  { %v280_v53 = vpop.permute.xlu1 %279 }
 0x2f1   :  { %v282_v56 = vmul.f32 %v280_v53, %v1019_v59 }
 0x2f3   :  { %v291_v60 = vmul.f32 %v282_v56, %v268_v41  ;;  %v286_v61 = vrot.slane %v282_v56, %v285_v52 }
 0x2f5   :  { %v293_v3 = vrot.slane %v291_v60, 7  ;;  %v288_v6 = vmul.f32 %v286_v61, %v1022_v1  ;;  %v287_v8 = vmul.f32 %v286_v61, %v1024_v2  ;;  %v290_v12 = vmul.f32 %v286_v61, %v1030_v10 }
 0x2f6   :  { %v289_v13 = vmul.f32 %v286_v61, %v1033_v11 }
 0x2f7   :  { %v295_v5 = vsub.f32 %v1019_v59, %v293_v3 }
 0x2f9   :  { %v299_v7 = vrot.slane %v295_v5, %v298_v0 }
 0x2fb   :  { %v301_v14 = vadd.f32 %v299_v7, %v288_v6  ;;  %v300_v16 = vadd.f32 %v299_v7, %v287_v8  ;;  %v303_v17 = vadd.f32 %v299_v7, %v290_v12  ;;  %v302_v18 = vadd.f32 %v299_v7, %v289_v13 }
 0x2fd   :  { %342 = vrot.lane.b32.xlu1 %v301_v14, %s921_s3  ;;  %v309_v19 = vrot.slane %v301_v14, 7  ;;  %v325_v21 = vrot.slane %v301_v14, 1  ;;  %340 = vrot.lane.b32.xlu0 %v300_v16, %s921_s3  ;;  %v308_v1 = vrot.slane %v300_v16, 7  ;;  %v324_v22 = vrot.slane %v300_v16, 1 }
 0x2fe   :  { %v313_v23 = vrot.slane %v303_v17, 7  ;;  %v311_v24 = vrot.slane %v302_v18, 7  ;;  %v327_v2 = vrot.slane %v302_v18, 1  ;;  %v329_v26 = vrot.slane %v303_v17, 1 }
 0x2ff   :  { %v310_v10 = vsel %vm35_vm1, %v308_v1, %v309_v19  ;;  %v326_v25 = vsel %vm56_vm0, %v324_v22, %v325_v21 }
 0x300   :  { %v328_v11 = vsel %vm56_vm0, %v325_v21, %v327_v2  ;;  %v314_v27 = vsel %vm35_vm1, %v311_v24, %v313_v23  ;;  %v312_v29 = vsel %vm35_vm1, %v309_v19, %v311_v24  ;;  %v336_v31 = vmul.f32 %v326_v25, %v970_v9 }
 0x301   :  { %346 = vrot.lane.b32.xlu1 %v303_v17, %s921_s3  ;;  %344 = vrot.lane.b32.xlu0 %v302_v18, %s921_s3  ;;  %v337_v30 = vmul.f32 %v328_v11, %v974_v15  ;;  %v335_v33 = vsel %vm56_vm0, %v329_v26, 0.0  ;;  %v330_v34 = vsel %vm56_vm0, %v327_v2, %v329_v26  ;;  %v319_v9 = vsel %vm35_vm1, 0.0, %v308_v1 }
 0x302   :  { %v339_v35 = vmul.f32 %v335_v33, %v986_v28  ;;  %v338_v37 = vmul.f32 %v330_v34, %v979_v20  ;;  %v321_v43 = vmul.f32 %v310_v10, %v995_v36  ;;  %v320_v44 = vmul.f32 %v319_v9, %v992_v32 }
 0x303   :  { %v323_v49 = vmul.f32 %v314_v27, %v1001_v42  ;;  %v322_v50 = vmul.f32 %v312_v29, %v997_v38  ;;  %v384_v38 = vsub.s32 3, %v1016_v57 }
 0x305   :  { %358 = vrot.lane.b32.xlu1 %v337_v30, %s923_s5  ;;  %356 = vrot.lane.b32.xlu0 %v336_v31, %s923_s5  ;;  %v385_v42 = vrot.slane %v1019_v59, %v384_v38 }
 0x309   :  { %362 = vrot.lane.b32.xlu1 %v339_v35, %s923_s5  ;;  %360 = vrot.lane.b32.xlu0 %v338_v37, %s923_s5 }
 0x36f   :  { %v343_v15 = vpop.permute.xlu1 %342  ;;  %v341_v39 = vpop.permute.xlu0 %340 }
 0x370   :  { %v369_v45 = vsel %vm248_vm6, %v321_v43, %v343_v15  ;;  %v368_v28 = vsel %vm248_vm6, %v320_v44, %v341_v39  ;;  %v927_v44 = vmov 0.0  }
 0x371   :  { %809 = vmatprep.mubr.msk.f32.mxu0 %vm926_vm10, %v927_v44 }
 0x373   :  { %v347_v40 = vpop.permute.xlu1 %346  ;;  %v345_v41 = vpop.permute.xlu0 %344 }
 0x374   :  { %v371_v32 = vsel %vm248_vm6, %v323_v49, %v347_v40  ;;  %v370_v36 = vsel %vm248_vm6, %v322_v50, %v345_v41  ;;  %v924_v41 = vmov 0.0|0.0  }
 0x375   :  { %839 = vmatprep.subr.bf16.mxu0 %v924_v41  ;;  %845 = vmatprep.subr.bf16.mxu1 %v924_v41 }
 0x377   :  { %v359_v20 = vpop.permute.xlu1 %358  ;;  %v357_v46 = vpop.permute.xlu0 %356 }
 0x378   :  { %v373_v47 = vsel %vm253_vm7, %v369_v45, %v359_v20  ;;  %v372_v48 = vsel %vm253_vm7, %v368_v28, %v357_v46  ;;  %v636_v45 = vld [vmem:[#allocation2 + $0x48] sm:$0xff]  ;;  %v637_v28 = vld [vmem:[#allocation2 + $0x50] sm:$0xff]  ;;  %v638_v20 = vld [vmem:[#allocation2 + $0x58] sm:$0xff] }
 0x379   :  { %795 = vmatprep.mubr.msk.f32.mxu1 %vm386_vm8, %v372_v48  ;;  %v846_v46 = vpack.c.bf16 %v637_v28, %v636_v45 }
 0x37a   :  { %796 = vmatmul.mubr.msk.f32.vlgmr.msra.gmra.mrb[0].mxu1 %vm386_vm8, %v373_v47  ;;  %v639_v47 = vld [vmem:[#allocation2 + $0x60] sm:$0xff] }
 0x37b   :  { %v363_v51 = vpop.permute.xlu1 %362  ;;  %v361_v52 = vpop.permute.xlu0 %360  ;;  %847 = vmatpush3.bf16.msra.mxu1 %v846_v46  ;;  %v849_v48 = vpack.c.bf16 %v639_v47, %v638_v20 }
 0x37c   :  { %v375_v53 = vsel %vm253_vm7, %v371_v32, %v363_v51  ;;  %v374_v54 = vsel %vm253_vm7, %v370_v36, %v361_v52  ;;  %848 = vmatprep.subr.bf16.mxu1 %v924_v41  ;;  %v543_v32 = vsub.s32 4, %v1016_v57  ;;  %v556_v51 = vsub.s32 5, %v1016_v57 }
 0x37d   :  { %798 = vmatprep.mubr.msk.f32.mxu1 %vm386_vm8, %v374_v54 }
 0x37e   :  { %799 = vmatmul.mubr.msk.f32.gmra.mrb[2].mxu1 %vm386_vm8, %v375_v53 }
 0x37f   :  { %820 = vmatprep.mubr.msk.f32.mxu1 %vm926_vm10, %v927_v44  ;;  %850 = vmatpush3.bf16.msra.mxu1 %v849_v48 }
 0x44d   :  { %v797_v55 = vpop.f32.mrb[0].mxu1 }
 0x44e   :  { %v471_v56 = vadd.f32 %v797_v55, %v385_v42  ;;  %v465_v58 = vpop.f32.mrb[1].mxu1 }
 0x44f   :  { %v466_v60 = vadd.f32 %v465_v58, %v385_v42 }
 0x450   :  { %v1101_v61 = vmax.f32 %v471_v56, 0.0 }
 0x451   :  { %v1103_v62 = vmax.f32 %v466_v60, 0.0  ;;  %v800_v63 = vpop.f32.mrb[2].mxu1 }
 0x452   :  { %v481_v0 = vadd.f32 %v800_v63, %v385_v42  ;;  %v475_v3 = vpop.f32.mrb[3].mxu1  ;;  %v489_v4 = vmul.f32 %v1101_v61, %v1101_v61 }
 0x453   :  { %v476_v5 = vadd.f32 %v475_v3, %v385_v42  ;;  %v488_v6 = vmul.f32 %v1103_v62, %v1103_v62 }
 0x454   :  { %v1109_v7 = vmax.f32 %v481_v0, 0.0  ;;  %498 = vrot.lane.b32.xlu1 %v489_v4, %s923_s5 }
 0x455   :  { %v1112_v8 = vmax.f32 %v476_v5, 0.0  ;;  %496 = vrot.lane.b32.xlu0 %v488_v6, %s923_s5  ;;  %v562_v6 = vld [vmem:[#allocation2 + $0x70] sm:$0x3] }
 0x456   :  { %v491_v12 = vmul.f32 %v1109_v7, %v1109_v7 }
 0x457   :  { %v490_v13 = vmul.f32 %v1112_v8, %v1112_v8 }
 0x458   :  { %502 = vrot.lane.b32.xlu1 %v491_v12, %s923_s5 }
 0x459   :  { %500 = vrot.lane.b32.xlu0 %v490_v13, %s923_s5 }
 0x4c6   :  { %v499_v14 = vpop.permute.xlu1 %498 }
 0x4c7   :  { %v509_v16 = vsel %vm253_vm7, %v1101_v61, %v499_v14  ;;  %v497_v17 = vpop.permute.xlu0 %496 }
 0x4c8   :  { %v508_v18 = vsel %vm253_vm7, %v1103_v62, %v497_v17  ;;  %v514_v19 = vsel %vm512_vm9, %v509_v16, 0.0 }
 0x4c9   :  { %v513_v21 = vsel %vm512_vm9, %v508_v18, 0.0 }
 0x4ca   :  { %v503_v1 = vpop.permute.xlu1 %502  ;;  %v515_v23 = vadd.f32 %v514_v19, %v513_v21 }
 0x4cb   :  { %v501_v22 = vpop.permute.xlu0 %500  ;;  %v511_v24 = vsel %vm253_vm7, %v1109_v7, %v503_v1 }
 0x4cc   :  { %v510_v2 = vsel %vm253_vm7, %v1112_v8, %v501_v22  ;;  %v518_v25 = vsel %vm512_vm9, %v511_v24, 0.0 }
 0x4cd   :  { %v516_v10 = vsel %vm512_vm9, %v510_v2, 0.0 }
 0x4ce   :  { %v517_v11 = vadd.f32 %v516_v10, %v515_v23 }
 0x4d0   :  { %v519_v26 = vadd.f32 %v518_v25, %v517_v11 }
 0x4d2   :  { %v520_v27 = vrot.slane %v519_v26, 4 }
 0x4d4   :  { %v521_v29 = vadd.f32 %v520_v27, %v519_v26 }
 0x4d6   :  { %v522_v30 = vrot.slane %v521_v29, 2 }
 0x4d8   :  { %v523_v31 = vadd.f32 %v522_v30, %v521_v29 }
 0x4da   :  { %v524_v33 = vrot.slane %v523_v31, 1 }
 0x4dc   :  { %v525_v34 = vadd.f32 %v524_v33, %v523_v31 }
 0x4de   :  { %v526_v35 = vmul.f32 0.03125, %v525_v34 }
 0x4e0   :  { %v527_v37 = vmul.f32 %v526_v35, %v526_v35 }
 0x4e2   :  { %529 = vrot.lane.b32.xlu0 %v527_v37, %s923_s5 }
 0x554   :  { %v530_v15 = vpop.permute.xlu0 %529 }
 0x555   :  { %v532_v39 = vsub.f32 %v526_v35, %v530_v15 }
 0x557   :  { %v533_v9 = vadd.f32 1e-05, %v532_v39 }
 0x559   :  { %866 = vrsqrt.f32 %v533_v9 }
 0x563   :  { %v867_v40 = vpop.eup %866 }
 0x564   :  { %v536_v43 = vrot.slane %v867_v40, 4 }
 0x566   :  { %537 = vrot.lane.b32.xlu1 %v536_v43, %s925_s6 }
 0x5d8   :  { %v538_v49 = vpop.permute.xlu1 %537 }
 0x5d9   :  { %v540_v50 = vmul.f32 %v538_v49, %v1019_v59 }
 0x5db   :  { %v549_v36 = vmul.f32 %v540_v50, %v526_v35  ;;  %v544_v52 = vrot.slane %v540_v50, %v543_v32 }
 0x5dd   :  { %v551_v53 = vrot.slane %v549_v36, 7  ;;  %v545_v38 = vmul.f32 %v544_v52, %v1103_v62  ;;  %v546_v42 = vmul.f32 %v544_v52, %v1101_v61  ;;  %v547_v56 = vmul.f32 %v544_v52, %v1112_v8 }
 0x5de   :  { %v548_v58 = vmul.f32 %v544_v52, %v1109_v7  ;;  %v642_v61 = vsub.s32 6, %v1016_v57 }
 0x5df   :  { %v553_v54 = vsub.f32 %v1019_v59, %v551_v53 }
 0x5e0   :  { %v643_v7 = vrot.slane %v1019_v59, %v642_v61 }
 0x5e1   :  { %v557_v55 = vrot.slane %v553_v54, %v556_v51 }
 0x5e3   :  { %v558_v60 = vadd.f32 %v557_v55, %v545_v38  ;;  %v559_v63 = vadd.f32 %v557_v55, %v546_v42  ;;  %v560_v3 = vadd.f32 %v557_v55, %v547_v56  ;;  %v561_v4 = vadd.f32 %v557_v55, %v548_v58 }
 0x5e5   :  { %v840_v0 = vpack.c.bf16 %v559_v63, %v558_v60  ;;  %v843_v5 = vpack.c.bf16 %v561_v4, %v560_v3 }
 0x5e7   :  { %841 = vmatpush3.bf16.msra.mxu0 %v840_v0 }
 0x5e8   :  { %842 = vmatprep.subr.bf16.mxu0 %v924_v41 }
 0x5eb   :  { %844 = vmatpush3.bf16.msra.mxu0 %v843_v5 }
 0x5ee   :  { %810 = vmatmul.mubr.msk.f32.vlgmr.msra.gmra.mrb[4].mxu0 %vm253_vm7, %v562_v6 }
 0x6c1   :  { %v632_v62 = vpop.f32.mrb[4].mxu0 }
 0x6c2   :  { %v811_v12 = vpop.f32.mrb[5].mxu0  ;;  %821 = vmatmul.mubr.msk.f32.vlgmr.msra.gmra.mrb[4].mxu1 %vm253_vm7, %v632_v62 }
 0x795   :  { %v713_v8 = vpop.f32.mrb[4].mxu1 }
 0x796   :  { %v714_v13 = vadd.f32 %v713_v8, %v643_v7  ;;  %v822_v14 = vpop.f32.mrb[5].mxu1 }
 0x798   :  { %717 = vst [vmem:[#allocation5] sm:$0x3] %v714_v13 }
 0x799   :  { %901 = shalt.err (!%p898_p12)
}
 0x79a   :  { %s902_s12 = scalar_lea.hbm %s1156_s2, 32 }
 0x79b   :  { %p903_p13 = scmp.ne.s32.totalorder %s1156_s2, %s902_s12  ;;  %p906_p0 = scmp.lt.u32.totalorder %s902_s12, %s1156_s2 }
 0x79d   :  { %p908_p1 = pnand %p906_p0, %p903_p13 }
 0x79f   :  { %911 = shalt.err (!%p908_p1)
}
 0x7a0   :  { %727 = dma.vmem_to_hbm [thread:$0]  %s725_s8, 32, %s1156_s2, [#allocation4]  }
 0x7a1   :  { %914 = dma.done.wait [#allocation4], 32  }
 0x7a2   :  { %915 = vsyncadd [#allocation4], 4294967264 }
 0x7a3   :  { %731 = vsyncpa [#allocation3], 1 }
 0x7a4   :  { %732 = vsyncpa [#allocation4], 1 }

</bundles_post_ra>
